<compile_context>
chip_gen: v6e
topology: v6e:2x2x1
jax: 0.10.0
libtpu: 0.0.40
codegen_flags: <defaults>
</compile_context>

<pallas_src>
import functools

import jax
import jax.numpy as jnp
from jax.experimental import pallas as pl
from jax.experimental.pallas import tpu as pltpu


# ---------------------------------------------------------------------------
# Fused STConv kernel (one batch element per grid step)
# ---------------------------------------------------------------------------
def _stconv_fused_kernel(x_ref, lhat_ref, w1_ref, th_ref, w2_ref, bias_ref,
                         o_ref, *, num_nodes, kernel_size, cheb_k, hidden,
                         out_channels, use_bf16):
    # x_ref   : (T1*N, k*Cin)   conv1 im2col, time-major rows (t*N + n)
    # lhat_ref: (2, N, N)       [L_hat ; 2*L_hat]
    # w1_ref  : (k*Cin, 2*H)    fused [W1+W3 | W2] for temporal_conv1
    # th_ref  : (K*H, H)        Chebyshev thetas, row-stacked
    # w2_ref  : (k*H, 2*Cout)   fused [W1+W3 | W2] for temporal_conv2
    # bias_ref: (1, 2H + H + 2Cout)  packed [b1 | cheb_bias | b2]
    # o_ref   : (T2*N, Cout)
    N, k, K, H, Cout = num_nodes, kernel_size, cheb_k, hidden, out_channels
    T1 = x_ref.shape[0] // N
    T2 = T1 - (k - 1)
    mm_dtype = jnp.bfloat16 if use_bf16 else jnp.float32

    def mm(a, b):
        # MXU matmul; bf16 operands on v6e/v7x when enabled, f32 accumulate.
        return jnp.dot(a.astype(mm_dtype), b.astype(mm_dtype),
                       preferred_element_type=jnp.float32)

    def gate(z, cout):
        # TemporalConv: relu(P + R + sigmoid(Q)).  Weights are pre-summed in
        # the glue so z[:, :cout] = P + R and z[:, cout:] = Q.
        q = z[:, cout:]
        sig = pl.reciprocal(1.0 + jnp.exp(-q), approx=True)   # EUP, not VALU
        return jnp.maximum(z[:, :cout] + sig, 0.0)

    bias = bias_ref[...].astype(jnp.float32)
    b1 = bias[:, :2 * H]
    cb = bias[:, 2 * H:3 * H]
    b2 = bias[:, 3 * H:]

    # --- temporal_conv1: single im2col matmul (taps unfolded in the glue) ---
    t1 = gate(mm(x_ref[...], w1_ref[...]) + b1, H)             # (T1*N, H)

    # --- ChebConv (per-time-slice Laplacian) + trailing F.relu --------------
    l1 = lhat_ref[0].astype(mm_dtype)                          # L_hat
    l2 = lhat_ref[1].astype(mm_dtype)                          # 2 * L_hat
    txs = [t1]
    if K > 1:
        tx1 = jnp.concatenate(
            [mm(l1, t1[t * N:(t + 1) * N, :]) for t in range(T1)], axis=0)
        txs.append(tx1)
        prev2, prev1 = t1, tx1
        for _ in range(2, K):
            nxt = jnp.concatenate(
                [mm(l2, prev1[t * N:(t + 1) * N, :]) for t in range(T1)],
                axis=0) - prev2
            txs.append(nxt)
            prev2, prev1 = prev1, nxt
    tx_cat = jnp.concatenate(txs, axis=1) if K > 1 else t1     # (T1*N, K*H)
    t2 = jnp.maximum(mm(tx_cat, th_ref[...]) + cb, 0.0)        # (T1*N, H)

    # --- temporal_conv2: in-kernel im2col (lane concat) + single matmul -----
    t2_cat = jnp.concatenate(
        [t2[dt * N:dt * N + T2 * N, :] for dt in range(k)], axis=1)
    t3 = gate(mm(t2_cat, w2_ref[...]) + b2, Cout)              # (T2*N, Cout)

    # TODO(synk): lane-dense (T2, N*Cout) output repack skipped on purpose —
    # it requires a sublane->lane relayout of a ~2 KiB block; narrow store
    # kept (negligible at this size, avoids a risky in-kernel reshape).
    o_ref[...] = t3.astype(o_ref.dtype)


# ---------------------------------------------------------------------------
# Glue: scaled Laplacian (sym norm, lambda_max = 2.0) and BatchNorm2d(num_nodes)
# ---------------------------------------------------------------------------
def scaled_laplacian(edge_index, edge_weight, num_nodes):
    # ChebConv 'sym' with default lambda_max=2.0:
    #   L_hat = 2/lambda_max * (I - D^{-1/2} A D^{-1/2}) - I = -D^{-1/2} A D^{-1/2}
    A = jnp.zeros((num_nodes, num_nodes), jnp.float32)
    A = A.at[edge_index[1], edge_index[0]].add(edge_weight)   # A[dst, src]
    deg = A.sum(axis=1)
    dis = jnp.where(deg > 0, deg ** -0.5, 0.0)
    return -(dis[:, None] * A * dis[None, :])


def batch_norm_over_nodes(t3, gamma, beta, eps=1e-5):
    # t3: (B, T, N, C); BatchNorm2d(num_nodes) acts on the node axis with
    # batch statistics (module default training mode, biased variance).
    mean = t3.mean(axis=(0, 1, 3))
    var = t3.var(axis=(0, 1, 3))
    xhat = (t3 - mean[None, None, :, None]) / jnp.sqrt(
        var[None, None, :, None] + eps)
    return xhat * gamma[None, None, :, None] + beta[None, None, :, None]


# ---------------------------------------------------------------------------
# Full STConv forward
# ---------------------------------------------------------------------------
def stconv_forward(X, edge_index, edge_weight, params, use_bf16_matmul=False):
    B, T, N, Cin = X.shape
    k = params["kernel_size"]
    theta = params["cheb_theta"]
    K, H, _ = theta.shape
    Cout = params["tc2_w1"].shape[2]
    T1 = T - (k - 1)
    T2 = T1 - (k - 1)

    # Branch-fused temporal-conv weights:
    #   relu(P + sigmoid(Q) + R) = relu((X*(W1+W3) + b1+b3) + sigmoid(X*W2 + b2))
    w1 = jnp.concatenate([params["tc1_w1"] + params["tc1_w3"],
                          params["tc1_w2"]], axis=-1).reshape(k * Cin, 2 * H)
    w2 = jnp.concatenate([params["tc2_w1"] + params["tc2_w3"],
                          params["tc2_w2"]], axis=-1).reshape(k * H, 2 * Cout)
    b1 = jnp.concatenate([params["tc1_b1"] + params["tc1_b3"],
                          params["tc1_b2"]], axis=-1)          # (1, 2H)
    b2 = jnp.concatenate([params["tc2_b1"] + params["tc2_b3"],
                          params["tc2_b2"]], axis=-1)          # (1, 2Cout)
    theta_flat = theta.reshape(K * H, H)
    bias_pack = jnp.concatenate([b1, params["cheb_bias"], b2], axis=-1)

    # Temporal-conv1 im2col (time-major rows t*N+n; tap dt -> lanes dt*Cin..).
    x_tm = X.reshape(B, T * N, Cin)
    x_unf = jnp.concatenate([x_tm[:, dt * N:dt * N + T1 * N, :]
                             for dt in range(k)], axis=-1)     # (B, T1*N, k*Cin)

    L_hat = scaled_laplacian(edge_index, edge_weight, N)       # (N, N)
    lhat_pack = jnp.stack([L_hat, 2.0 * L_hat], axis=0)        # (2, N, N)

    kernel = functools.partial(
        _stconv_fused_kernel, num_nodes=N, kernel_size=k, cheb_k=K,
        hidden=H, out_channels=Cout, use_bf16=use_bf16_matmul)

    t3 = pl.pallas_call(
        kernel,
        out_shape=jax.ShapeDtypeStruct((B, T2 * N, Cout), X.dtype),
        grid_spec=pltpu.PrefetchScalarGridSpec(
            num_scalar_prefetch=0,
            grid=(B,),
            in_specs=[
                pl.BlockSpec((pl.Squeezed(), T1 * N, k * Cin),
                             lambda b: (b, 0, 0)),
                pl.BlockSpec((2, N, N), lambda b: (0, 0, 0)),
                pl.BlockSpec((k * Cin, 2 * H), lambda b: (0, 0)),
                pl.BlockSpec((K * H, H), lambda b: (0, 0)),
                pl.BlockSpec((k * H, 2 * Cout), lambda b: (0, 0)),
                pl.BlockSpec((1, 3 * H + 2 * Cout), lambda b: (0, 0)),
            ],
            out_specs=pl.BlockSpec((pl.Squeezed(), T2 * N, Cout),
                                   lambda b: (b, 0, 0)),
        ),
        compiler_params=pltpu.CompilerParams(
            dimension_semantics=("parallel",)),
    )(x_unf, lhat_pack, w1, theta_flat, w2, bias_pack)

    t3 = t3.reshape(B, T2, N, Cout)
    # TODO(synk): BatchNorm2d(num_nodes) batch-statistics reduction kept in
    # plain JAX (tiny cross-batch reduction; not worth a Pallas kernel here).
    return batch_norm_over_nodes(t3, params["bn_gamma"], params["bn_beta"])


# ---------------------------------------------------------------------------
# Deterministic setup + run
# ---------------------------------------------------------------------------
if __name__ == "__main__":
    B, T, N = 2, 8, 16
    Cin, hidden, Cout = 4, 32, 8
    kernel_size, K = 3, 3

    key = jax.random.PRNGKey(0)
    keys = jax.random.split(key, 12)

    def w(kk, shape, scale=0.1):
        return (scale * jax.random.normal(kk, shape)).astype(jnp.float32)

    params = dict(
        kernel_size=kernel_size,
        # TemporalConv1 (Conv2d weight (Cout,Cin,1,k) stored as (k,Cin,Cout))
        tc1_w1=w(keys[0], (kernel_size, Cin, hidden)),
        tc1_w2=w(keys[1], (kernel_size, Cin, hidden)),
        tc1_w3=w(keys[2], (kernel_size, Cin, hidden)),
        tc1_b1=w(keys[3], (1, hidden)),
        tc1_b2=w(keys[4], (1, hidden)),
        tc1_b3=w(keys[5], (1, hidden)),
        # ChebConv
        cheb_theta=w(keys[6], (K, hidden, hidden)),
        cheb_bias=w(keys[7], (1, hidden)),
        # TemporalConv2
        tc2_w1=w(keys[8], (kernel_size, hidden, Cout)),
        tc2_w2=w(keys[9], (kernel_size, hidden, Cout)),
        tc2_w3=w(keys[10], (kernel_size, hidden, Cout)),
        tc2_b1=jnp.zeros((1, Cout), jnp.float32),
        tc2_b2=jnp.zeros((1, Cout), jnp.float32),
        tc2_b3=jnp.zeros((1, Cout), jnp.float32),
        # BatchNorm2d(num_nodes) affine params (PyTorch default init)
        bn_gamma=jnp.ones((N,), jnp.float32),
        bn_beta=jnp.zeros((N,), jnp.float32),
    )

    # Input: (batch, input_time_steps, num_nodes, in_channels)
    X = jax.random.normal(keys[11], (B, T, N, Cin), jnp.float32)

    # Undirected ring graph with symmetric positive weights.
    src = jnp.arange(N, dtype=jnp.int32)
    dst = (src + 1) % N
    ring_w = 0.5 + jax.random.uniform(jax.random.PRNGKey(1), (N,), jnp.float32)
    edge_index = jnp.stack([jnp.concatenate([src, dst]),
                            jnp.concatenate([dst, src])], axis=0)
    edge_weight = jnp.concatenate([ring_w, ring_w])

    # use_bf16_matmul=False keeps f32 MXU operands (v5e-safe default); flip
    # to True on v6e/v7x for the bf16 MXU path recommended in the review.
    fwd = jax.jit(functools.partial(stconv_forward, params=params,
                                    use_bf16_matmul=False))
    out = jax.block_until_ready(fwd(X, edge_index, edge_weight))

    expected_T = T - 2 * (kernel_size - 1)
    assert out.shape == (B, expected_T, N, Cout), out.shape
    assert bool(jnp.all(jnp.isfinite(out)))
    print("KERNEL_OK")
</pallas_src>

<mosaic_0001>
module attributes {stable_mosaic.version = 11 : i64} {
  func.func private @main(%arg0: i32) attributes {dimension_semantics = [#tpu.dimension_semantics<core_parallel>], iteration_bounds = array<i64: 2>, tpu.core_type = #tpu.core_type<sc_scalar_subcore>, window_params = []} {
    return
  }
}

module attributes {stable_mosaic.version = 11 : i64} {
  func.func private @main(%arg0: i32) attributes {dimension_semantics = [#tpu.dimension_semantics<core_parallel>], iteration_bounds = array<i64: 2>, tpu.core_type = #tpu.core_type<sc_scalar_subcore>, window_params = []} {
    return
  }
}

module attributes {stable_mosaic.version = 11 : i64} {
  func.func @_stconv_fused_kernel(%arg0: i32, %arg1: memref<1x96x12xf32, #tpu.memory_space<vmem>>, %arg2: memref<2x16x16xf32, #tpu.memory_space<vmem>>, %arg3: memref<12x64xf32, #tpu.memory_space<vmem>>, %arg4: memref<96x32xf32, #tpu.memory_space<vmem>>, %arg5: memref<96x16xf32, #tpu.memory_space<vmem>>, %arg6: memref<1x112xf32, #tpu.memory_space<vmem>>, %arg7: memref<1x64x8xf32, #tpu.memory_space<vmem>>) attributes {dimension_semantics = [#tpu.dimension_semantics<parallel>], iteration_bounds = array<i64: 2>, scalar_prefetch = 0 : i64, scratch_operands = 0 : i64, tpu.core_type = #tpu.core_type<tc>, window_params = [{transform_indices = @transform_0, window_bounds = array<i64: 1, 96, 12>}, {pipeline_mode = #tpu.pipeline_mode<synchronous>, transform_indices = @transform_1, window_bounds = array<i64: 2, 16, 16>}, {pipeline_mode = #tpu.pipeline_mode<synchronous>, transform_indices = @transform_2, window_bounds = array<i64: 12, 64>}, {pipeline_mode = #tpu.pipeline_mode<synchronous>, transform_indices = @transform_3, window_bounds = array<i64: 96, 32>}, {pipeline_mode = #tpu.pipeline_mode<synchronous>, transform_indices = @transform_4, window_bounds = array<i64: 96, 16>}, {pipeline_mode = #tpu.pipeline_mode<synchronous>, transform_indices = @transform_5, window_bounds = array<i64: 1, 112>}, {transform_indices = @transform_6, window_bounds = array<i64: 1, 64, 8>}]} {
    %c0 = arith.constant 0 : index
    %c0_0 = arith.constant 0 : index
    %0 = vector.load %arg6[%c0, %c0_0] : memref<1x112xf32, #tpu.memory_space<vmem>>, vector<1x112xf32>
    %1 = vector.extract_strided_slice %0 {offsets = [0, 0], sizes = [1, 64], strides = [1, 1]} : vector<1x112xf32> to vector<1x64xf32>
    %2 = vector.extract_strided_slice %0 {offsets = [0, 64], sizes = [1, 32], strides = [1, 1]} : vector<1x112xf32> to vector<1x32xf32>
    %3 = vector.extract_strided_slice %0 {offsets = [0, 96], sizes = [1, 16], strides = [1, 1]} : vector<1x112xf32> to vector<1x16xf32>
    %c0_1 = arith.constant 0 : index
    %c0_2 = arith.constant 0 : index
    %c0_3 = arith.constant 0 : index
    %4 = vector.load %arg1[%c0_1, %c0_2, %c0_3] : memref<1x96x12xf32, #tpu.memory_space<vmem>>, vector<1x96x12xf32>
    %5 = vector.shape_cast %4 : vector<1x96x12xf32> to vector<96x12xf32>
    %c0_4 = arith.constant 0 : index
    %c0_5 = arith.constant 0 : index
    %6 = vector.load %arg3[%c0_4, %c0_5] : memref<12x64xf32, #tpu.memory_space<vmem>>, vector<12x64xf32>
    %cst = arith.constant dense<0.000000e+00> : vector<96x64xf32>
    %7 = tpu.matmul %5, %6, %cst {dimension_numbers = #tpu.dot_dimension_numbers<[1], [0], [0], [1], [0, 0, 1, 1], [], []>} : vector<96x12xf32>, vector<12x64xf32>, vector<96x64xf32> -> vector<96x64xf32>
    %8 = vector.broadcast %1 : vector<1x64xf32> to vector<96x64xf32>
    %9 = arith.addf %7, %8 : vector<96x64xf32>
    %10 = vector.extract_strided_slice %9 {offsets = [0, 32], sizes = [96, 32], strides = [1, 1]} : vector<96x64xf32> to vector<96x32xf32>
    %cst_6 = arith.constant 0.000000e+00 : f32
    %11 = vector.broadcast %cst_6 : f32 to vector<96x32xf32>
    %12 = arith.subf %11, %10 : vector<96x32xf32>
    %13 = math.exp %12 : vector<96x32xf32>
    %cst_7 = arith.constant 1.000000e+00 : f32
    %14 = vector.broadcast %cst_7 : f32 to vector<96x32xf32>
    %15 = arith.addf %14, %13 : vector<96x32xf32>
    %16 = tpu.reciprocal %15 {approx = true} : vector<96x32xf32> -> vector<96x32xf32>
    %17 = vector.extract_strided_slice %9 {offsets = [0, 0], sizes = [96, 32], strides = [1, 1]} : vector<96x64xf32> to vector<96x32xf32>
    %18 = arith.addf %17, %16 : vector<96x32xf32>
    %cst_8 = arith.constant 0.000000e+00 : f32
    %19 = vector.broadcast %cst_8 : f32 to vector<96x32xf32>
    %20 = arith.maximumf %18, %19 : vector<96x32xf32>
    %c0_9 = arith.constant 0 : index
    %c0_10 = arith.constant 0 : index
    %c0_11 = arith.constant 0 : index
    %21 = vector.load %arg2[%c0_9, %c0_10, %c0_11] : memref<2x16x16xf32, #tpu.memory_space<vmem>>, vector<1x16x16xf32>
    %22 = vector.shape_cast %21 : vector<1x16x16xf32> to vector<16x16xf32>
    %c1 = arith.constant 1 : index
    %c0_12 = arith.constant 0 : index
    %c0_13 = arith.constant 0 : index
    %23 = vector.load %arg2[%c1, %c0_12, %c0_13] : memref<2x16x16xf32, #tpu.memory_space<vmem>>, vector<1x16x16xf32>
    %24 = vector.shape_cast %23 : vector<1x16x16xf32> to vector<16x16xf32>
    %25 = vector.extract_strided_slice %20 {offsets = [0, 0], sizes = [16, 32], strides = [1, 1]} : vector<96x32xf32> to vector<16x32xf32>
    %cst_14 = arith.constant dense<0.000000e+00> : vector<16x32xf32>
    %26 = tpu.matmul %22, %25, %cst_14 {dimension_numbers = #tpu.dot_dimension_numbers<[1], [0], [0], [1], [0, 0, 1, 1], [], []>} : vector<16x16xf32>, vector<16x32xf32>, vector<16x32xf32> -> vector<16x32xf32>
    %27 = vector.extract_strided_slice %20 {offsets = [16, 0], sizes = [16, 32], strides = [1, 1]} : vector<96x32xf32> to vector<16x32xf32>
    %cst_15 = arith.constant dense<0.000000e+00> : vector<16x32xf32>
    %28 = tpu.matmul %22, %27, %cst_15 {dimension_numbers = #tpu.dot_dimension_numbers<[1], [0], [0], [1], [0, 0, 1, 1], [], []>} : vector<16x16xf32>, vector<16x32xf32>, vector<16x32xf32> -> vector<16x32xf32>
    %29 = vector.extract_strided_slice %20 {offsets = [32, 0], sizes = [16, 32], strides = [1, 1]} : vector<96x32xf32> to vector<16x32xf32>
    %cst_16 = arith.constant dense<0.000000e+00> : vector<16x32xf32>
    %30 = tpu.matmul %22, %29, %cst_16 {dimension_numbers = #tpu.dot_dimension_numbers<[1], [0], [0], [1], [0, 0, 1, 1], [], []>} : vector<16x16xf32>, vector<16x32xf32>, vector<16x32xf32> -> vector<16x32xf32>
    %31 = vector.extract_strided_slice %20 {offsets = [48, 0], sizes = [16, 32], strides = [1, 1]} : vector<96x32xf32> to vector<16x32xf32>
    %cst_17 = arith.constant dense<0.000000e+00> : vector<16x32xf32>
    %32 = tpu.matmul %22, %31, %cst_17 {dimension_numbers = #tpu.dot_dimension_numbers<[1], [0], [0], [1], [0, 0, 1, 1], [], []>} : vector<16x16xf32>, vector<16x32xf32>, vector<16x32xf32> -> vector<16x32xf32>
    %33 = vector.extract_strided_slice %20 {offsets = [64, 0], sizes = [16, 32], strides = [1, 1]} : vector<96x32xf32> to vector<16x32xf32>
    %cst_18 = arith.constant dense<0.000000e+00> : vector<16x32xf32>
    %34 = tpu.matmul %22, %33, %cst_18 {dimension_numbers = #tpu.dot_dimension_numbers<[1], [0], [0], [1], [0, 0, 1, 1], [], []>} : vector<16x16xf32>, vector<16x32xf32>, vector<16x32xf32> -> vector<16x32xf32>
    %35 = vector.extract_strided_slice %20 {offsets = [80, 0], sizes = [16, 32], strides = [1, 1]} : vector<96x32xf32> to vector<16x32xf32>
    %cst_19 = arith.constant dense<0.000000e+00> : vector<16x32xf32>
    %36 = tpu.matmul %22, %35, %cst_19 {dimension_numbers = #tpu.dot_dimension_numbers<[1], [0], [0], [1], [0, 0, 1, 1], [], []>} : vector<16x16xf32>, vector<16x32xf32>, vector<16x32xf32> -> vector<16x32xf32>
    %37 = tpu.concatenate %26, %28, %30, %32, %34, %36 in 0 : vector<16x32xf32>, vector<16x32xf32>, vector<16x32xf32>, vector<16x32xf32>, vector<16x32xf32>, vector<16x32xf32> -> vector<96x32xf32>
    %38 = vector.extract_strided_slice %37 {offsets = [0, 0], sizes = [16, 32], strides = [1, 1]} : vector<96x32xf32> to vector<16x32xf32>
    %cst_20 = arith.constant dense<0.000000e+00> : vector<16x32xf32>
    %39 = tpu.matmul %24, %38, %cst_20 {dimension_numbers = #tpu.dot_dimension_numbers<[1], [0], [0], [1], [0, 0, 1, 1], [], []>} : vector<16x16xf32>, vector<16x32xf32>, vector<16x32xf32> -> vector<16x32xf32>
    %40 = vector.extract_strided_slice %37 {offsets = [16, 0], sizes = [16, 32], strides = [1, 1]} : vector<96x32xf32> to vector<16x32xf32>
    %cst_21 = arith.constant dense<0.000000e+00> : vector<16x32xf32>
    %41 = tpu.matmul %24, %40, %cst_21 {dimension_numbers = #tpu.dot_dimension_numbers<[1], [0], [0], [1], [0, 0, 1, 1], [], []>} : vector<16x16xf32>, vector<16x32xf32>, vector<16x32xf32> -> vector<16x32xf32>
    %42 = vector.extract_strided_slice %37 {offsets = [32, 0], sizes = [16, 32], strides = [1, 1]} : vector<96x32xf32> to vector<16x32xf32>
    %cst_22 = arith.constant dense<0.000000e+00> : vector<16x32xf32>
    %43 = tpu.matmul %24, %42, %cst_22 {dimension_numbers = #tpu.dot_dimension_numbers<[1], [0], [0], [1], [0, 0, 1, 1], [], []>} : vector<16x16xf32>, vector<16x32xf32>, vector<16x32xf32> -> vector<16x32xf32>
    %44 = vector.extract_strided_slice %37 {offsets = [48, 0], sizes = [16, 32], strides = [1, 1]} : vector<96x32xf32> to vector<16x32xf32>
    %cst_23 = arith.constant dense<0.000000e+00> : vector<16x32xf32>
    %45 = tpu.matmul %24, %44, %cst_23 {dimension_numbers = #tpu.dot_dimension_numbers<[1], [0], [0], [1], [0, 0, 1, 1], [], []>} : vector<16x16xf32>, vector<16x32xf32>, vector<16x32xf32> -> vector<16x32xf32>
    %46 = vector.extract_strided_slice %37 {offsets = [64, 0], sizes = [16, 32], strides = [1, 1]} : vector<96x32xf32> to vector<16x32xf32>
    %cst_24 = arith.constant dense<0.000000e+00> : vector<16x32xf32>
    %47 = tpu.matmul %24, %46, %cst_24 {dimension_numbers = #tpu.dot_dimension_numbers<[1], [0], [0], [1], [0, 0, 1, 1], [], []>} : vector<16x16xf32>, vector<16x32xf32>, vector<16x32xf32> -> vector<16x32xf32>
    %48 = vector.extract_strided_slice %37 {offsets = [80, 0], sizes = [16, 32], strides = [1, 1]} : vector<96x32xf32> to vector<16x32xf32>
    %cst_25 = arith.constant dense<0.000000e+00> : vector<16x32xf32>
    %49 = tpu.matmul %24, %48, %cst_25 {dimension_numbers = #tpu.dot_dimension_numbers<[1], [0], [0], [1], [0, 0, 1, 1], [], []>} : vector<16x16xf32>, vector<16x32xf32>, vector<16x32xf32> -> vector<16x32xf32>
    %50 = tpu.concatenate %39, %41, %43, %45, %47, %49 in 0 : vector<16x32xf32>, vector<16x32xf32>, vector<16x32xf32>, vector<16x32xf32>, vector<16x32xf32>, vector<16x32xf32> -> vector<96x32xf32>
    %51 = arith.subf %50, %20 : vector<96x32xf32>
    %52 = tpu.concatenate %20, %37, %51 in 1 : vector<96x32xf32>, vector<96x32xf32>, vector<96x32xf32> -> vector<96x96xf32>
    %c0_26 = arith.constant 0 : index
    %c0_27 = arith.constant 0 : index
    %53 = vector.load %arg4[%c0_26, %c0_27] : memref<96x32xf32, #tpu.memory_space<vmem>>, vector<96x32xf32>
    %cst_28 = arith.constant dense<0.000000e+00> : vector<96x32xf32>
    %54 = tpu.matmul %52, %53, %cst_28 {dimension_numbers = #tpu.dot_dimension_numbers<[1], [0], [0], [1], [0, 0, 1, 1], [], []>} : vector<96x96xf32>, vector<96x32xf32>, vector<96x32xf32> -> vector<96x32xf32>
    %55 = vector.broadcast %2 : vector<1x32xf32> to vector<96x32xf32>
    %56 = arith.addf %54, %55 : vector<96x32xf32>
    %cst_29 = arith.constant 0.000000e+00 : f32
    %57 = vector.broadcast %cst_29 : f32 to vector<96x32xf32>
    %58 = arith.maximumf %56, %57 : vector<96x32xf32>
    %59 = vector.extract_strided_slice %58 {offsets = [0, 0], sizes = [64, 32], strides = [1, 1]} : vector<96x32xf32> to vector<64x32xf32>
    %60 = vector.extract_strided_slice %58 {offsets = [16, 0], sizes = [64, 32], strides = [1, 1]} : vector<96x32xf32> to vector<64x32xf32>
    %61 = vector.extract_strided_slice %58 {offsets = [32, 0], sizes = [64, 32], strides = [1, 1]} : vector<96x32xf32> to vector<64x32xf32>
    %62 = tpu.concatenate %59, %60, %61 in 1 : vector<64x32xf32>, vector<64x32xf32>, vector<64x32xf32> -> vector<64x96xf32>
    %c0_30 = arith.constant 0 : index
    %c0_31 = arith.constant 0 : index
    %63 = vector.load %arg5[%c0_30, %c0_31] : memref<96x16xf32, #tpu.memory_space<vmem>>, vector<96x16xf32>
    %cst_32 = arith.constant dense<0.000000e+00> : vector<64x16xf32>
    %64 = tpu.matmul %62, %63, %cst_32 {dimension_numbers = #tpu.dot_dimension_numbers<[1], [0], [0], [1], [0, 0, 1, 1], [], []>} : vector<64x96xf32>, vector<96x16xf32>, vector<64x16xf32> -> vector<64x16xf32>
    %65 = vector.broadcast %3 : vector<1x16xf32> to vector<64x16xf32>
    %66 = arith.addf %64, %65 : vector<64x16xf32>
    %67 = vector.extract_strided_slice %66 {offsets = [0, 8], sizes = [64, 8], strides = [1, 1]} : vector<64x16xf32> to vector<64x8xf32>
    %cst_33 = arith.constant 0.000000e+00 : f32
    %68 = vector.broadcast %cst_33 : f32 to vector<64x8xf32>
    %69 = arith.subf %68, %67 : vector<64x8xf32>
    %70 = math.exp %69 : vector<64x8xf32>
    %cst_34 = arith.constant 1.000000e+00 : f32
    %71 = vector.broadcast %cst_34 : f32 to vector<64x8xf32>
    %72 = arith.addf %71, %70 : vector<64x8xf32>
    %73 = tpu.reciprocal %72 {approx = true} : vector<64x8xf32> -> vector<64x8xf32>
    %74 = vector.extract_strided_slice %66 {offsets = [0, 0], sizes = [64, 8], strides = [1, 1]} : vector<64x16xf32> to vector<64x8xf32>
    %75 = arith.addf %74, %73 : vector<64x8xf32>
    %cst_35 = arith.constant 0.000000e+00 : f32
    %76 = vector.broadcast %cst_35 : f32 to vector<64x8xf32>
    %77 = arith.maximumf %75, %76 : vector<64x8xf32>
    %c0_36 = arith.constant 0 : index
    %c0_37 = arith.constant 0 : index
    %c0_38 = arith.constant 0 : index
    %78 = vector.load %arg7[%c0_36, %c0_37, %c0_38] : memref<1x64x8xf32, #tpu.memory_space<vmem>>, vector<1x64x8xf32>
    %79 = vector.shape_cast %78 : vector<1x64x8xf32> to vector<64x8xf32>
    %80 = vector.shape_cast %77 : vector<64x8xf32> to vector<1x64x8xf32>
    tpu.vector_store %arg7[%c0_36, %c0_37, %c0_38], %80 {strides = array<i32>} : memref<1x64x8xf32, #tpu.memory_space<vmem>>, vector<1x64x8xf32>,
    return
  }
  func.func @transform_0(%arg0: i32) -> (i32, i32, i32) {
    %c0_i32 = arith.constant 0 : i32
    %c0_i32_0 = arith.constant 0 : i32
    %c0_i32_1 = arith.constant 0 : i32
    return %arg0, %c0_i32, %c0_i32_0 : i32, i32, i32
  }
  func.func @transform_1(%arg0: i32) -> (i32, i32, i32) {
    %c0_i32 = arith.constant 0 : i32
    %c0_i32_0 = arith.constant 0 : i32
    %c0_i32_1 = arith.constant 0 : i32
    %c0_i32_2 = arith.constant 0 : i32
    return %c0_i32, %c0_i32_0, %c0_i32_1 : i32, i32, i32
  }
  func.func @transform_2(%arg0: i32) -> (i32, i32) {
    %c0_i32 = arith.constant 0 : i32
    %c0_i32_0 = arith.constant 0 : i32
    %c0_i32_1 = arith.constant 0 : i32
    return %c0_i32, %c0_i32_0 : i32, i32
  }
  func.func @transform_3(%arg0: i32) -> (i32, i32) {
    %c0_i32 = arith.constant 0 : i32
    %c0_i32_0 = arith.constant 0 : i32
    %c0_i32_1 = arith.constant 0 : i32
    return %c0_i32, %c0_i32_0 : i32, i32
  }
  func.func @transform_4(%arg0: i32) -> (i32, i32) {
    %c0_i32 = arith.constant 0 : i32
    %c0_i32_0 = arith.constant 0 : i32
    %c0_i32_1 = arith.constant 0 : i32
    return %c0_i32, %c0_i32_0 : i32, i32
  }
  func.func @transform_5(%arg0: i32) -> (i32, i32) {
    %c0_i32 = arith.constant 0 : i32
    %c0_i32_0 = arith.constant 0 : i32
    %c0_i32_1 = arith.constant 0 : i32
    return %c0_i32, %c0_i32_0 : i32, i32
  }
  func.func @transform_6(%arg0: i32) -> (i32, i32, i32) {
    %c0_i32 = arith.constant 0 : i32
    %c0_i32_0 = arith.constant 0 : i32
    %c0_i32_1 = arith.constant 0 : i32
    return %arg0, %c0_i32, %c0_i32_0 : i32, i32, i32
  }
}

</mosaic_0001>

<bundles_post_ra>
// kernel: stconv_forward.1
= control target key start
LH: loop header
LB: loop body
LE: loop exit
PB: predicated region body
PF: predicated region fallthrough
CT: control target
= control target key end

     0   :  { %s2687_s21 = smov 0   ;;  %s3162_s0 = inlined_call_operand.vmem [shape: f32[2,96,12], index: 0, kind: input, shape index: {}]   ;;  %s3163_s1 = inlined_call_operand.vmem [shape: f32[2,16,16], index: 1, kind: input, shape index: {}]   ;;  %s3164_s2 = inlined_call_operand.vmem [shape: f32[12,64], index: 2, kind: input, shape index: {}]   ;;  %s3165_s3 = inlined_call_operand.vmem [shape: f32[96,32], index: 3, kind: input, shape index: {}]   ;;  %s3166_s4 = inlined_call_operand.vmem [shape: f32[96,16], index: 4, kind: input, shape index: {}]   ;;  %s3167_s5 = inlined_call_operand.vmem [shape: f32[1,112], index: 5, kind: input, shape index: {}]   ;;  %s3168_s6 = inlined_call_operand.vmem [shape: f32[2,64,8], index: 6, kind: output, shape index: {}]  }
   0x1 LB: > { %s2182_s22 = sadd.s32 4294967295, %s2646_s21   ;;  %p2186_p0 = scmp.ge.s32.totalorder %s2646_s21, 1  ;;  %s2646_s21 = sphi %s2687_s21, %s16_s21  }
   0x2   : > { %p212_p1 = scmp.lt.s32.totalorder %s2646_s21, 3 }
   0x4   : > { %p213_p2 = pnand %p2186_p0, %p212_p1 }
   0x5   : > { %p242_p3 = scmp.lt.s32.totalorder (!%p213_p2), %s2182_s22, 1  ;;  %s2648_s11 = smov (!%p213_p2), 96  }
   0x6   : > { %216 = sbr.rel (%p213_p2) target bundleno = 1583 (0x62f), region = 44  ;;  %s2649_s16 = smov (!%p213_p2), 32  }
   0x7   : > { %s2650_s24 = smov (!%p213_p2), 64  }
   0xb   : > { %v266_v0 = vld [vmem:[%s3164_s2 + $0x8] sm:$0xf]  ;;  %vm310_vm0 = vcmask 1043456   ;;  %v265_v1 = vld [vmem:[%s3164_s2] sm:$0xff]  ;;  %s3170_s22 = smov (!%p242_p3, %s2182_s22), 1  ;;  %vm273_vm1 = vcmask 97280  }
   0xc   : > { %2359 = vmatprep.subr.msk.mxu0 %vm310_vm0, %v266_v0  ;;  %2543 = vmatprep.subr.msk.mxu1 %vm310_vm0, %v266_v0  ;;  %s2547_s27 = smul.u32 96, %s3170_s22  ;;  %v2722_v14 = vld [vmem:[%s3167_s5] ss:$0 sm:$0xff]  ;;  %vm576_vm2 = vcmask 130048   ;;  %vm1597_vm3 = vcmask 261120   ;;  %vm1610_vm4 = vcmask 523264  }
   0xd   : > { %2360 = vmatpush3.msk.msra.mxu0 %vm310_vm0, %v266_v0  ;;  %2545 = vmatpush3.msk.msra.mxu1 %vm310_vm0, %v266_v0  ;;  %vm1638_vm5 = vcmask 785408   ;;  %vm2118_vm6 = vcmask 64512  }
   0xe   : > { %2361 = vmatprep.subr.mxu0 %v265_v1  ;;  %2544 = vmatprep.subr.mxu1 %v265_v1  ;;  %s246_s30 = scalar_lea.vmem %s3162_s0, %s2547_s27 }
   0xf   : > { %2362 = vmatpush3.msra.mxu0 %v265_v1  ;;  %2546 = vmatpush3.msra.mxu1 %v265_v1  ;;  %v253_v2 = vld [vmem:[%s246_s30] sm:$0xff]  ;;  %v254_v3 = vld [vmem:[%s246_s30 + $0x8] sm:$0xff]  ;;  %v255_v4 = vld [vmem:[%s246_s30 + $0x10] sm:$0xff] }
  0x10   : > { %2363 = vmatprep.mubr.msk.f32.mxu0 %vm273_vm1, %v253_v2  ;;  %v256_v5 = vld [vmem:[%s246_s30 + $0x18] sm:$0xff]  ;;  %v263_v6 = vld [vmem:[%s246_s30 + $0x50] sm:$0xff]  ;;  %v257_v8 = vld [vmem:[%s246_s30 + $0x20] sm:$0xff] }
  0x11   : > { %2364 = vmatmul.mubr.msk.f32.vlgmr.msra.gmra.mxu0 %vm273_vm1, %v254_v3  ;;  %v264_v7 = vld [vmem:[%s246_s30 + $0x58] sm:$0xff]  ;;  %2378 = vmatprep.mubr.msk.f32.mxu1 %vm273_vm1, %v263_v6  ;;  %v258_v9 = vld [vmem:[%s246_s30 + $0x28] sm:$0xff]  ;;  %v259_v10 = vld [vmem:[%s246_s30 + $0x30] sm:$0xff] }
  0x12   : > { %2366 = vmatprep.mubr.msk.f32.mxu0 %vm273_vm1, %v255_v4  ;;  %2379 = vmatmul.mubr.msk.f32.vlgmr.msra.gmra.mxu1 %vm273_vm1, %v264_v7  ;;  %v260_v11 = vld [vmem:[%s246_s30 + $0x38] sm:$0xff]  ;;  %v261_v12 = vld [vmem:[%s246_s30 + $0x40] sm:$0xff]  ;;  %v262_v13 = vld [vmem:[%s246_s30 + $0x48] sm:$0xff] }
  0x15   : > { %2367 = vmatmul.mubr.msk.f32.gmra.mxu0 %vm273_vm1, %v256_v5 }
  0x16   : > { %2369 = vmatprep.mubr.msk.f32.mxu0 %vm273_vm1, %v257_v8 }
  0x19   : > { %2370 = vmatmul.mubr.msk.f32.gmra.mxu0 %vm273_vm1, %v258_v9 }
  0x1a   : > { %2372 = vmatprep.mubr.msk.f32.mxu0 %vm273_vm1, %v259_v10 }
  0x1d   : > { %2373 = vmatmul.mubr.msk.f32.gmra.mxu0 %vm273_vm1, %v260_v11 }
  0x1e   : > { %2375 = vmatprep.mubr.msk.f32.mxu0 %vm273_vm1, %v261_v12 }
  0x21   : > { %2376 = vmatmul.mubr.msk.f32.gmra.mxu0 %vm273_vm1, %v262_v13 }
  0xd1   : > { %v2365_v15 = vpop.f32.mrf.mxu0 }
  0xd2   : > { %v2725_v16 = vadd.f32 %v2365_v15, %v2722_v14  ;;  %v2380_v24 = vpop.f32.mrf.mxu1  ;;  %v2775_v15 = vld [vmem:[%s3163_s1] sm:$0xff] }
  0xd3   : > { %v380_v17 = vpop.f32.mrf.mxu0  ;;  %v2740_v31 = vadd.f32 %v2380_v24, %v2722_v14  ;;  %2385 = vmatprep.mubr.msk.f32.mxu1 %vm576_vm2, %v2775_v15 }
  0xd4   : > { %v440_v18 = vsub.f32 0.0, %v2725_v16  ;;  %v2729_v19 = vadd.f32 %v2722_v14, %v380_v17  ;;  %v430_v29 = vpop.f32.mrf.mxu1 }
  0xd5   : > { %v2368_v20 = vpop.f32.mrf.mxu0  ;;  %v2747_v36 = vadd.f32 %v2722_v14, %v430_v29  ;;  %v450_v41 = vsub.f32 0.0, %v2740_v31 }
  0xd6   : > { %v453_v21 = vmul.f32 1.442695, %v440_v18  ;;  %v439_v22 = vsub.f32 0.0, %v2729_v19  ;;  %v2733_v23 = vadd.f32 %v2368_v20, %v2722_v14 }
  0xd7   : > { %v390_v25 = vpop.f32.mrf.mxu0  ;;  %v449_v46 = vsub.f32 0.0, %v2747_v36  ;;  %v473_v51 = vmul.f32 1.442695, %v450_v41 }
  0xd8   : > { %2560 = vpow2.f32 %v453_v21  ;;  %v451_v26 = vmul.f32 1.442695, %v439_v22  ;;  %v442_v27 = vsub.f32 0.0, %v2733_v23  ;;  %v2737_v28 = vadd.f32 %v2722_v14, %v390_v25 }
  0xd9   : > { %v2371_v30 = vpop.f32.mrf.mxu0  ;;  %v471_v56 = vmul.f32 1.442695, %v449_v46 }
  0xda   : > { %2562 = vpow2.f32 %v451_v26  ;;  %v457_v32 = vmul.f32 1.442695, %v442_v27  ;;  %v441_v33 = vsub.f32 0.0, %v2737_v28  ;;  %v2744_v34 = vadd.f32 %v2371_v30, %v2722_v14 }
  0xdb   : > { %v400_v35 = vpop.f32.mrf.mxu0 }
  0xdc   : > { %2564 = vpow2.f32 %v457_v32  ;;  %v455_v37 = vmul.f32 1.442695, %v441_v33  ;;  %v444_v38 = vsub.f32 0.0, %v2744_v34  ;;  %v2751_v39 = vadd.f32 %v2722_v14, %v400_v35 }
  0xdd   : > { %v2374_v40 = vpop.f32.mrf.mxu0 }
  0xde   : > { %2566 = vpow2.f32 %v455_v37  ;;  %v461_v42 = vmul.f32 1.442695, %v444_v38  ;;  %v443_v43 = vsub.f32 0.0, %v2751_v39  ;;  %v2756_v44 = vadd.f32 %v2374_v40, %v2722_v14 }
  0xdf   : > { %v410_v45 = vpop.f32.mrf.mxu0 }
  0xe0   : > { %2568 = vpow2.f32 %v461_v42  ;;  %v459_v47 = vmul.f32 1.442695, %v443_v43  ;;  %v446_v48 = vsub.f32 0.0, %v2756_v44  ;;  %v2761_v49 = vadd.f32 %v2722_v14, %v410_v45 }
  0xe1   : > { %v2377_v50 = vpop.f32.mrf.mxu0 }
  0xe2   : > { %2570 = vpow2.f32 %v459_v47  ;;  %v465_v52 = vmul.f32 1.442695, %v446_v48  ;;  %v445_v53 = vsub.f32 0.0, %v2761_v49  ;;  %v2765_v54 = vadd.f32 %v2377_v50, %v2722_v14 }
  0xe3   : > { %v420_v55 = vpop.f32.mrf.mxu0 }
  0xe4   : > { %2572 = vpow2.f32 %v465_v52  ;;  %v463_v57 = vmul.f32 1.442695, %v445_v53  ;;  %v448_v58 = vsub.f32 0.0, %v2765_v54  ;;  %v2769_v59 = vadd.f32 %v2722_v14, %v420_v55 }
  0xe5   : > { %v2561_v60 = vpop.eup %2560  ;;  %2574 = vpow2.f32 %v473_v51 }
  0xe6   : > { %v476_v61 = vadd.f32 1.0, %v2561_v60  ;;  %2576 = vpow2.f32 %v463_v57  ;;  %v469_v62 = vmul.f32 1.442695, %v448_v58  ;;  %v447_v63 = vsub.f32 0.0, %v2769_v59 }
  0xe7   : > { %v2563_v0 = vpop.eup %2562  ;;  %2578 = vpow2.f32 %v471_v56 }
  0xe8   : > { %2580 = vrcp.f32 %v476_v61  ;;  %v475_v1 = vadd.f32 1.0, %v2563_v0  ;;  %v467_v2 = vmul.f32 1.442695, %v447_v63 }
  0xe9   : > { %v2565_v3 = vpop.eup %2564  ;;  %2582 = vpow2.f32 %v469_v62 }
  0xea   : > { %2584 = vrcp.f32 %v475_v1  ;;  %v478_v4 = vadd.f32 1.0, %v2565_v3 }
  0xeb   : > { %v2567_v5 = vpop.eup %2566  ;;  %2586 = vpow2.f32 %v467_v2 }
  0xec   : > { %2588 = vrcp.f32 %v478_v4  ;;  %v477_v6 = vadd.f32 1.0, %v2567_v5 }
  0xed   : > { %v2569_v7 = vpop.eup %2568 }
  0xee   : > { %v480_v8 = vadd.f32 1.0, %v2569_v7  ;;  %2590 = vrcp.f32 %v477_v6 }
  0xef   : > { %v2571_v9 = vpop.eup %2570 }
  0xf0   : > { %2592 = vrcp.f32 %v480_v8  ;;  %v479_v10 = vadd.f32 1.0, %v2571_v9 }
  0xf1   : > { %v2573_v11 = vpop.eup %2572 }
  0xf2   : > { %v2575_v12 = vpop.eup %2574  ;;  %v482_v13 = vadd.f32 1.0, %v2573_v11  ;;  %2594 = vrcp.f32 %v479_v10 }
  0xf3   : > { %v2577_v17 = vpop.eup %2576  ;;  %v486_v24 = vadd.f32 1.0, %v2575_v12 }
  0xf4   : > { %v2579_v18 = vpop.eup %2578  ;;  %2596 = vrcp.f32 %v482_v13  ;;  %v481_v20 = vadd.f32 1.0, %v2577_v17  ;;  %v2205_v13 = vld [vmem:[%s3163_s1 + $0x18] sm:$0xff] }
  0xf5   : > { %v2581_v21 = vpop.eup %2580  ;;  %v485_v32 = vadd.f32 1.0, %v2579_v18 }
  0xf6   : > { %v2583_v22 = vpop.eup %2582  ;;  %2598 = vrcp.f32 %v481_v20  ;;  %513 = vrot.lane.b32.xlu0 %v2581_v21, %s2648_s11 }
  0xf7   : > { %v2585_v25 = vpop.eup %2584  ;;  %v484_v26 = vadd.f32 1.0, %v2583_v22 }
  0xf8   : > { %v2587_v27 = vpop.eup %2586 }
  0xf9   : > { %v2589_v29 = vpop.eup %2588  ;;  %2600 = vrcp.f32 %v484_v26  ;;  %v483_v30 = vadd.f32 1.0, %v2587_v27 }
  0xfa   : > { %2602 = vrcp.f32 %v486_v24  ;;  %517 = vrot.lane.b32.xlu1 %v2589_v29, %s2648_s11  ;;  %511 = vrot.lane.b32.xlu0 %v2585_v25, %s2648_s11  ;;  %v1634_v29 = vld [vmem:[%s3165_s3 + $0x58] sm:$0xff] }
  0xfb   : > { %2604 = vrcp.f32 %v483_v30  ;;  %v2591_v33 = vpop.eup %2590  ;;  %v1633_v30 = vld [vmem:[%s3165_s3 + $0x50] sm:$0xff] }
  0xfc   : > { %2606 = vrcp.f32 %v485_v32  ;;  %v1632_v32 = vld [vmem:[%s3165_s3 + $0x48] sm:$0xff] }
  0xfd   : > { %v2593_v35 = vpop.eup %2592 }
  0xfe   : > { %515 = vrot.lane.b32.xlu1 %v2591_v33, %s2648_s11  ;;  %521 = vrot.lane.b32.xlu0 %v2593_v35, %s2648_s11  ;;  %v1631_v33 = vld [vmem:[%s3165_s3 + $0x40] sm:$0xff]  ;;  %v1630_v35 = vld [vmem:[%s3165_s3 + $0x38] sm:$0xff] }
  0xff   : > { %v2595_v37 = vpop.eup %2594 }
 0x101   : > { %v2597_v38 = vpop.eup %2596 }
 0x102   : > { %519 = vrot.lane.b32.xlu1 %v2595_v37, %s2648_s11  ;;  %525 = vrot.lane.b32.xlu0 %v2597_v38, %s2648_s11  ;;  %v1629_v37 = vld [vmem:[%s3165_s3 + $0x30] sm:$0xff]  ;;  %v1628_v38 = vld [vmem:[%s3165_s3 + $0x28] sm:$0xff] }
 0x103   : > { %v2599_v40 = vpop.eup %2598 }
 0x106   : > { %v2601_v41 = vpop.eup %2600  ;;  %523 = vrot.lane.b32.xlu1 %v2599_v40, %s2648_s11  ;;  %v1627_v40 = vld [vmem:[%s3165_s3 + $0x20] sm:$0xff] }
 0x107   : > { %v2603_v42 = vpop.eup %2602  ;;  %529 = vrot.lane.b32.xlu0 %v2601_v41, %s2648_s11  ;;  %v1626_v41 = vld [vmem:[%s3165_s3 + $0x18] sm:$0xff] }
 0x108   : > { %v2605_v43 = vpop.eup %2604 }
 0x109   : > { %v2607_v45 = vpop.eup %2606 }
 0x10a   : > { %527 = vrot.lane.b32.xlu1 %v2605_v43, %s2648_s11  ;;  %v1624_v43 = vld [vmem:[%s3165_s3 + $0x8] sm:$0xff] }
 0x10b   : > { %533 = vrot.lane.b32.xlu0 %v2603_v42, %s2648_s11  ;;  %v1625_v42 = vld [vmem:[%s3165_s3 + $0x10] sm:$0xff] }
 0x10e   : > { %531 = vrot.lane.b32.xlu1 %v2607_v45, %s2648_s11  ;;  %v1623_v45 = vld [vmem:[%s3165_s3] sm:$0xff] }
 0x168   : > { %v514_v46 = vpop.permute.xlu0 %513 }
 0x169   : > { %v548_v47 = vadd.f32 %v514_v46, %v2725_v16  ;;  %v572_v16 = vld [vmem:[%s3163_s1 + $0x8] sm:$0xff] }
 0x16b   : > { %v2792_v48 = vmax.f32 %v548_v47, 0.0 }
 0x16c   : > { %v518_v50 = vpop.permute.xlu1 %517  ;;  %v512_v51 = vpop.permute.xlu0 %511 }
 0x16d   : > { %v550_v52 = vadd.f32 %v518_v50, %v2733_v23  ;;  %v547_v53 = vadd.f32 %v512_v51, %v2729_v19  ;;  %2381 = vmatprep.subr.mxu1 %v2792_v48 }
 0x16e   : > { %2382 = vmatpush3.msra.mxu1 %v2792_v48 }
 0x16f   : > { %v2798_v55 = vmax.f32 %v547_v53, 0.0  ;;  %v2803_v58 = vmax.f32 %v550_v52, 0.0 }
 0x170   : > { %v516_v56 = vpop.permute.xlu1 %515  ;;  %v522_v57 = vpop.permute.xlu0 %521 }
 0x171   : > { %v549_v60 = vadd.f32 %v516_v56, %v2737_v28  ;;  %v552_v23 = vadd.f32 %v522_v57, %v2744_v34  ;;  %2383 = vmatprep.subr.mxu1 %v2798_v55 }
 0x172   : > { %2384 = vmatpush3.msra.mxu1 %v2798_v55 }
 0x173   : > { %v2809_v19 = vmax.f32 %v549_v60, 0.0  ;;  %2386 = vmatmul.mubr.msk.f32.vlgmr.msra.gmra.mxu1 %vm576_vm2, %v572_v16  ;;  %2388 = vmatprep.subr.mxu1 %v2803_v58  ;;  %v2816_v28 = vmax.f32 %v552_v23, 0.0 }
 0x174   : > { %v520_v61 = vpop.permute.xlu1 %519  ;;  %2389 = vmatpush3.msra.mxu1 %v2803_v58  ;;  %v526_v62 = vpop.permute.xlu0 %525  ;;  %2392 = vmatprep.mubr.msk.f32.mxu1 %vm576_vm2, %v2775_v15 }
 0x175   : > { %v551_v34 = vadd.f32 %v520_v61, %v2751_v39  ;;  %v554_v63 = vadd.f32 %v526_v62, %v2756_v44  ;;  %2390 = vmatprep.subr.mxu1 %v2809_v19 }
 0x176   : > { %2391 = vmatpush3.msra.mxu1 %v2809_v19 }
 0x177   : > { %v2822_v0 = vmax.f32 %v551_v34, 0.0  ;;  %2393 = vmatmul.mubr.msk.f32.vlgmr.msra.gmra.mxu1 %vm576_vm2, %v572_v16  ;;  %2395 = vmatprep.subr.mxu1 %v2816_v28  ;;  %v2829_v2 = vmax.f32 %v554_v63, 0.0 }
 0x178   : > { %v524_v1 = vpop.permute.xlu1 %523  ;;  %2396 = vmatpush3.msra.mxu1 %v2816_v28  ;;  %2399 = vmatprep.mubr.msk.f32.mxu1 %vm576_vm2, %v2775_v15 }
 0x179   : > { %v553_v39 = vadd.f32 %v524_v1, %v2761_v49  ;;  %v530_v44 = vpop.permute.xlu0 %529  ;;  %2397 = vmatprep.subr.mxu1 %v2822_v0 }
 0x17a   : > { %v556_v3 = vadd.f32 %v530_v44, %v2765_v54  ;;  %2398 = vmatpush3.msra.mxu1 %v2822_v0 }
 0x17b   : > { %v2835_v4 = vmax.f32 %v553_v39, 0.0  ;;  %2400 = vmatmul.mubr.msk.f32.vlgmr.msra.gmra.mxu1 %vm576_vm2, %v572_v16  ;;  %2402 = vmatprep.subr.mxu1 %v2829_v2 }
 0x17c   : > { %v528_v5 = vpop.permute.xlu1 %527  ;;  %2403 = vmatpush3.msra.mxu1 %v2829_v2  ;;  %2406 = vmatprep.mubr.msk.f32.mxu1 %vm576_vm2, %v2775_v15  ;;  %v2842_v49 = vmax.f32 %v556_v3, 0.0 }
 0x17d   : > { %v555_v6 = vadd.f32 %v528_v5, %v2769_v59  ;;  %v534_v7 = vpop.permute.xlu0 %533  ;;  %2404 = vmatprep.subr.mxu1 %v2835_v4 }
 0x17e   : > { %v558_v54 = vadd.f32 %v534_v7, %v2740_v31  ;;  %2405 = vmatpush3.msra.mxu1 %v2835_v4 }
 0x17f   : > { %v2848_v8 = vmax.f32 %v555_v6, 0.0  ;;  %2407 = vmatmul.mubr.msk.f32.vlgmr.msra.gmra.mxu1 %vm576_vm2, %v572_v16  ;;  %2409 = vmatprep.subr.mxu1 %v2842_v49 }
 0x180   : > { %v532_v9 = vpop.permute.xlu1 %531  ;;  %2410 = vmatpush3.msra.mxu1 %v2842_v49  ;;  %2413 = vmatprep.mubr.msk.f32.mxu1 %vm576_vm2, %v2775_v15  ;;  %v2855_v59 = vmax.f32 %v558_v54, 0.0 }
 0x181   : > { %v557_v10 = vadd.f32 %v532_v9, %v2747_v36  ;;  %2411 = vmatprep.subr.mxu1 %v2848_v8  ;;  %v2204_v36 = vld [vmem:[%s3163_s1 + $0x10] sm:$0xff] }
 0x182   : > { %2412 = vmatpush3.msra.mxu1 %v2848_v8  ;;  %2427 = vmatprep.mubr.msk.f32.mxu0 %vm576_vm2, %v2204_v36 }
 0x183   : > { %v2860_v31 = vmax.f32 %v557_v10, 0.0  ;;  %2414 = vmatmul.mubr.msk.f32.vlgmr.msra.gmra.mxu1 %vm576_vm2, %v572_v16  ;;  %2416 = vmatprep.subr.mxu1 %v2855_v59 }
 0x184   : > { %2417 = vmatpush3.msra.mxu1 %v2855_v59  ;;  %2420 = vmatprep.mubr.msk.f32.mxu1 %vm576_vm2, %v2775_v15 }
 0x185   : > { %2418 = vmatprep.subr.mxu1 %v2860_v31 }
 0x186   : > { %2419 = vmatpush3.msra.mxu1 %v2860_v31 }
 0x187   : > { %2421 = vmatmul.mubr.msk.f32.vlgmr.msra.gmra.mxu1 %vm576_vm2, %v572_v16 }
 0x188   : > { %2434 = vmatprep.mubr.msk.f32.mxu1 %vm576_vm2, %v2204_v36 }
 0x233   : > { %v2387_v11 = vpop.f32.mrf.mxu1 }
 0x234   : > { %1515 = vrot.lane.b32.xlu1 %v2387_v11, %s2649_s16  ;;  %2423 = vmatprep.subr.mxu0 %v2387_v11 }
 0x235   : > { %v649_v12 = vpop.f32.mrf.mxu1  ;;  %2424 = vmatpush3.msra.mxu0 %v2387_v11 }
 0x236   : > { %1513 = vrot.lane.b32.xlu0 %v649_v12, %s2649_s16  ;;  %2425 = vmatprep.subr.mxu0 %v649_v12 }
 0x237   : > { %v2394_v15 = vpop.f32.mrf.mxu1  ;;  %2426 = vmatpush3.msra.mxu0 %v649_v12 }
 0x238   : > { %2428 = vmatmul.mubr.msk.f32.vlgmr.msra.gmra.mxu0 %vm576_vm2, %v2205_v13  ;;  %1519 = vrot.lane.b32.xlu1 %v2394_v15, %s2649_s16 }
 0x239   : > { %2430 = vmatprep.subr.mxu1 %v2394_v15  ;;  %v724_v17 = vpop.f32.mrf.mxu1  ;;  %2441 = vmatprep.mubr.msk.f32.mxu0 %vm576_vm2, %v2204_v36 }
 0x23a   : > { %2431 = vmatpush3.msra.mxu1 %v2394_v15  ;;  %1517 = vrot.lane.b32.xlu0 %v724_v17, %s2649_s16 }
 0x23b   : > { %2432 = vmatprep.subr.mxu1 %v724_v17  ;;  %v2401_v18 = vpop.f32.mrf.mxu1 }
 0x23c   : > { %2433 = vmatpush3.msra.mxu1 %v724_v17  ;;  %1523 = vrot.lane.b32.xlu1 %v2401_v18, %s2649_s16 }
 0x23d   : > { %2435 = vmatmul.mubr.msk.f32.vlgmr.msra.gmra.mxu1 %vm576_vm2, %v2205_v13  ;;  %2437 = vmatprep.subr.mxu0 %v2401_v18  ;;  %v799_v20 = vpop.f32.mrf.mxu1 }
 0x23e   : > { %2438 = vmatpush3.msra.mxu0 %v2401_v18  ;;  %1521 = vrot.lane.b32.xlu0 %v799_v20, %s2649_s16 }
 0x23f   : > { %2439 = vmatprep.subr.mxu0 %v799_v20  ;;  %v2408_v21 = vpop.f32.mrf.mxu1  ;;  %2448 = vmatprep.mubr.msk.f32.mxu1 %vm576_vm2, %v2204_v36 }
 0x240   : > { %2440 = vmatpush3.msra.mxu0 %v799_v20  ;;  %1527 = vrot.lane.b32.xlu1 %v2408_v21, %s2649_s16 }
 0x241   : > { %2442 = vmatmul.mubr.msk.f32.vlgmr.msra.gmra.mxu0 %vm576_vm2, %v2205_v13  ;;  %2444 = vmatprep.subr.mxu1 %v2408_v21  ;;  %v874_v22 = vpop.f32.mrf.mxu1 }
 0x242   : > { %2445 = vmatpush3.msra.mxu1 %v2408_v21  ;;  %1525 = vrot.lane.b32.xlu0 %v874_v22, %s2649_s16 }
 0x243   : > { %2446 = vmatprep.subr.mxu1 %v874_v22  ;;  %v2415_v24 = vpop.f32.mrf.mxu1  ;;  %2455 = vmatprep.mubr.msk.f32.mxu0 %vm576_vm2, %v2204_v36 }
 0x244   : > { %2447 = vmatpush3.msra.mxu1 %v874_v22  ;;  %1531 = vrot.lane.b32.xlu1 %v2415_v24, %s2649_s16 }
 0x245   : > { %2449 = vmatmul.mubr.msk.f32.vlgmr.msra.gmra.mxu1 %vm576_vm2, %v2205_v13  ;;  %2451 = vmatprep.subr.mxu0 %v2415_v24  ;;  %v949_v25 = vpop.f32.mrf.mxu1 }
 0x246   : > { %2452 = vmatpush3.msra.mxu0 %v2415_v24  ;;  %1529 = vrot.lane.b32.xlu0 %v949_v25, %s2649_s16 }
 0x247   : > { %2453 = vmatprep.subr.mxu0 %v949_v25  ;;  %v2422_v26 = vpop.f32.mrf.mxu1  ;;  %2462 = vmatprep.mubr.msk.f32.mxu1 %vm576_vm2, %v2204_v36 }
 0x248   : > { %2454 = vmatpush3.msra.mxu0 %v949_v25  ;;  %1535 = vrot.lane.b32.xlu1 %v2422_v26, %s2649_s16 }
 0x249   : > { %2456 = vmatmul.mubr.msk.f32.vlgmr.msra.gmra.mxu0 %vm576_vm2, %v2205_v13  ;;  %2458 = vmatprep.subr.mxu1 %v2422_v26  ;;  %v1024_v27 = vpop.f32.mrf.mxu1 }
 0x24a   : > { %2459 = vmatpush3.msra.mxu1 %v2422_v26  ;;  %1533 = vrot.lane.b32.xlu0 %v1024_v27, %s2649_s16 }
 0x24b   : > { %2460 = vmatprep.subr.mxu1 %v1024_v27  ;;  %2465 = vmatprep.subr.mxu0 %v1634_v29 }
 0x24c   : > { %2461 = vmatpush3.msra.mxu1 %v1024_v27  ;;  %2466 = vmatpush3.msra.mxu0 %v1634_v29 }
 0x24d   : > { %2463 = vmatmul.mubr.msk.f32.vlgmr.msra.gmra.mxu1 %vm576_vm2, %v2205_v13  ;;  %2467 = vmatprep.subr.mxu0 %v1633_v30 }
 0x24e   : > { %2468 = vmatpush3.msra.mxu0 %v1633_v30 }
 0x24f   : > { %2469 = vmatprep.subr.mxu0 %v1632_v32 }
 0x250   : > { %2470 = vmatpush3.msra.mxu0 %v1632_v32 }
 0x251   : > { %2471 = vmatprep.subr.mxu0 %v1631_v33 }
 0x252   : > { %2472 = vmatpush3.msra.mxu0 %v1631_v33 }
 0x253   : > { %2473 = vmatprep.subr.mxu0 %v1630_v35 }
 0x254   : > { %2474 = vmatpush3.msra.mxu0 %v1630_v35 }
 0x255   : > { %2475 = vmatprep.subr.mxu0 %v1629_v37 }
 0x256   : > { %2476 = vmatpush3.msra.mxu0 %v1629_v37 }
 0x257   : > { %2477 = vmatprep.subr.mxu0 %v1628_v38 }
 0x258   : > { %2478 = vmatpush3.msra.mxu0 %v1628_v38 }
 0x259   : > { %2479 = vmatprep.subr.mxu0 %v1627_v40 }
 0x25a   : > { %2480 = vmatpush3.msra.mxu0 %v1627_v40 }
 0x25b   : > { %2481 = vmatprep.subr.mxu0 %v1626_v41 }
 0x25c   : > { %2482 = vmatpush3.msra.mxu0 %v1626_v41 }
 0x25d   : > { %2483 = vmatprep.subr.mxu0 %v1625_v42 }
 0x25e   : > { %2484 = vmatpush3.msra.mxu0 %v1625_v42 }
 0x25f   : > { %2485 = vmatprep.subr.mxu0 %v1624_v43 }
 0x260   : > { %2486 = vmatpush3.msra.mxu0 %v1624_v43 }
 0x261   : > { %2487 = vmatprep.subr.mxu0 %v1623_v45 }
 0x262   : > { %2488 = vmatpush3.msra.mxu0 %v1623_v45 }
 0x2a6   : > { %v1516_v10 = vpop.permute.xlu1 %1515 }
 0x2a7   : > { %v1599_v29 = vsel %vm1597_vm3, %v2792_v48, %v1516_v10 }
 0x2a8   : > { %v1514_v36 = vpop.permute.xlu0 %1513 }
 0x2a9   : > { %v1598_v26 = vsel %vm1597_vm3, %v2798_v55, %v1514_v36 }
 0x2aa   : > { %v1520_v11 = vpop.permute.xlu1 %1519 }
 0x2ac   : > { %v1518_v12 = vpop.permute.xlu0 %1517 }
 0x2ad   : > { %v1600_v35 = vsel %vm1597_vm3, %v2809_v19, %v1518_v12 }
 0x2ae   : > { %v1524_v13 = vpop.permute.xlu1 %1523 }
 0x2b0   : > { %v1522_v15 = vpop.permute.xlu0 %1521 }
 0x2b1   : > { %v1602_v41 = vsel %vm1597_vm3, %v2822_v0, %v1522_v15 }
 0x2b2   : > { %v1528_v17 = vpop.permute.xlu1 %1527 }
 0x2b4   : > { %v1526_v18 = vpop.permute.xlu0 %1525 }
 0x2b6   : > { %v1532_v20 = vpop.permute.xlu1 %1531 }
 0x2b8   : > { %v1530_v21 = vpop.permute.xlu0 %1529 }
 0x2ba   : > { %v1536_v22 = vpop.permute.xlu1 %1535 }
 0x2bc   : > { %v1534_v24 = vpop.permute.xlu0 %1533 }
 0x2f8   : > { %v2429_v46 = vpop.f32.mrf.mxu0 }
 0x2f9   : > { %v1490_v47 = vsub.f32 %v2429_v46, %v2792_v48  ;;  %v1604_v46 = vsel %vm1597_vm3, %v2835_v4, %v1526_v18 }
 0x2fa   : > { %v1105_v50 = vpop.f32.mrf.mxu0 }
 0x2fb   : > { %v1489_v51 = vsub.f32 %v1105_v50, %v2798_v55  ;;  %1563 = vrot.lane.b32.xlu1 %v1490_v47, %s2650_s24  ;;  %v1601_v55 = vsel %vm1597_vm3, %v2803_v58, %v1520_v11 }
 0x2fd   : > { %v2436_v52 = vpop.f32.mrf.mxu1  ;;  %1561 = vrot.lane.b32.xlu0 %v1489_v51, %s2650_s24 }
 0x2fe   : > { %v1492_v53 = vsub.f32 %v2436_v52, %v2803_v58  ;;  %v1606_v52 = vsel %vm1597_vm3, %v2848_v8, %v1530_v21 }
 0x2ff   : > { %v1180_v56 = vpop.f32.mrf.mxu1 }
 0x300   : > { %v1491_v57 = vsub.f32 %v1180_v56, %v2809_v19  ;;  %1567 = vrot.lane.b32.xlu1 %v1492_v53, %s2650_s24  ;;  %v1603_v19 = vsel %vm1597_vm3, %v2816_v28, %v1524_v13 }
 0x301   : > { %v2443_v16 = vpop.f32.mrf.mxu0 }
 0x302   : > { %v1494_v60 = vsub.f32 %v2443_v16, %v2816_v28  ;;  %1565 = vrot.lane.b32.xlu0 %v1491_v57, %s2650_s24  ;;  %v1608_v16 = vsel %vm1597_vm3, %v2860_v31, %v1534_v24 }
 0x303   : > { %v1255_v23 = vpop.f32.mrf.mxu0 }
 0x304   : > { %v1493_v61 = vsub.f32 %v1255_v23, %v2822_v0  ;;  %1571 = vrot.lane.b32.xlu1 %v1494_v60, %s2650_s24  ;;  %v1605_v0 = vsel %vm1597_vm3, %v2829_v2, %v1528_v17 }
 0x305   : > { %v2450_v62 = vpop.f32.mrf.mxu1 }
 0x306   : > { %v1496_v34 = vsub.f32 %v2450_v62, %v2829_v2  ;;  %1569 = vrot.lane.b32.xlu0 %v1493_v61, %s2650_s24  ;;  %v1897_v61 = vld [vmem:[%s3166_s4 + $0x58] sm:$0xff]  ;;  %v1894_v62 = vld [vmem:[%s3166_s4 + $0x40] sm:$0xff] }
 0x307   : > { %v1330_v63 = vpop.f32.mrf.mxu1  ;;  %2507 = vmatprep.subr.mxu1 %v1897_v61 }
 0x308   : > { %v1495_v1 = vsub.f32 %v1330_v63, %v2835_v4  ;;  %1575 = vrot.lane.b32.xlu1 %v1496_v34, %s2650_s24  ;;  %v1607_v4 = vsel %vm1597_vm3, %v2842_v49, %v1532_v20  ;;  %2508 = vmatpush3.msra.mxu1 %v1897_v61  ;;  %v1893_v34 = vld [vmem:[%s3166_s4 + $0x38] sm:$0xff]  ;;  %v1892_v63 = vld [vmem:[%s3166_s4 + $0x30] sm:$0xff] }
 0x309   : > { %v2457_v39 = vpop.f32.mrf.mxu0 }
 0x30a   : > { %v1498_v44 = vsub.f32 %v2457_v39, %v2842_v49  ;;  %1573 = vrot.lane.b32.xlu0 %v1495_v1, %s2650_s24  ;;  %v1891_v1 = vld [vmem:[%s3166_s4 + $0x28] sm:$0xff]  ;;  %v1890_v39 = vld [vmem:[%s3166_s4 + $0x20] sm:$0xff] }
 0x30b   : > { %v1405_v3 = vpop.f32.mrf.mxu0 }
 0x30c   : > { %v1497_v5 = vsub.f32 %v1405_v3, %v2848_v8  ;;  %1579 = vrot.lane.b32.xlu1 %v1498_v44, %s2650_s24  ;;  %v1609_v8 = vsel %vm1597_vm3, %v2855_v59, %v1536_v22  ;;  %v1889_v44 = vld [vmem:[%s3166_s4 + $0x18] sm:$0xff]  ;;  %v1888_v3 = vld [vmem:[%s3166_s4 + $0x10] sm:$0xff] }
 0x30d   : > { %v2464_v6 = vpop.f32.mrf.mxu1 }
 0x30e   : > { %v1500_v7 = vsub.f32 %v2464_v6, %v2855_v59  ;;  %1577 = vrot.lane.b32.xlu0 %v1497_v5, %s2650_s24  ;;  %v1895_v59 = vld [vmem:[%s3166_s4 + $0x48] sm:$0xff] }
 0x30f   : > { %v1480_v54 = vpop.f32.mrf.mxu1  ;;  %v1887_v6 = vld [vmem:[%s3166_s4 + $0x8] sm:$0xff] }
 0x310   : > { %v1499_v9 = vsub.f32 %v1480_v54, %v2860_v31  ;;  %1583 = vrot.lane.b32.xlu1 %v1500_v7, %s2650_s24  ;;  %v1896_v31 = vld [vmem:[%s3166_s4 + $0x50] sm:$0xff]  ;;  %v1886_v54 = vld [vmem:[%s3166_s4] sm:$0xff] }
 0x311   : > { %2509 = vmatprep.subr.mxu1 %v1896_v31 }
 0x312   : > { %1581 = vrot.lane.b32.xlu0 %v1499_v9, %s2650_s24  ;;  %2510 = vmatpush3.msra.mxu1 %v1896_v31 }
 0x313   : > { %2511 = vmatprep.subr.mxu1 %v1895_v59 }
 0x314   : > { %2512 = vmatpush3.msra.mxu1 %v1895_v59 }
 0x315   : > { %2513 = vmatprep.subr.mxu1 %v1894_v62 }
 0x316   : > { %1635 = vrot.lane.b32.xlu0 %v2722_v14, %s2650_s24  ;;  %2514 = vmatpush3.msra.mxu1 %v1894_v62 }
 0x317   : > { %2515 = vmatprep.subr.mxu1 %v1893_v34 }
 0x318   : > { %2516 = vmatpush3.msra.mxu1 %v1893_v34 }
 0x319   : > { %2517 = vmatprep.subr.mxu1 %v1892_v63 }
 0x31a   : > { %2518 = vmatpush3.msra.mxu1 %v1892_v63 }
 0x31b   : > { %2519 = vmatprep.subr.mxu1 %v1891_v1 }
 0x31c   : > { %2520 = vmatpush3.msra.mxu1 %v1891_v1 }
 0x31d   : > { %2521 = vmatprep.subr.mxu1 %v1890_v39 }
 0x31e   : > { %2522 = vmatpush3.msra.mxu1 %v1890_v39 }
 0x31f   : > { %2523 = vmatprep.subr.mxu1 %v1889_v44 }
 0x320   : > { %2524 = vmatpush3.msra.mxu1 %v1889_v44 }
 0x321   : > { %2525 = vmatprep.subr.mxu1 %v1888_v3 }
 0x322   : > { %2526 = vmatpush3.msra.mxu1 %v1888_v3 }
 0x323   : > { %2527 = vmatprep.subr.mxu1 %v1887_v6 }
 0x324   : > { %2528 = vmatpush3.msra.mxu1 %v1887_v6 }
 0x325   : > { %2529 = vmatprep.subr.mxu1 %v1886_v54 }
 0x326   : > { %2530 = vmatpush3.msra.mxu1 %v1886_v54 }
 0x36d   : > { %v1564_v25 = vpop.permute.xlu1 %1563 }
 0x36e   : > { %v1612_v32 = vsel %vm1610_vm4, %v1599_v29, %v1564_v25 }
 0x36f   : > { %v1562_v27 = vpop.permute.xlu0 %1561 }
 0x370   : > { %v1611_v30 = vsel %vm1610_vm4, %v1598_v26, %v1562_v27 }
 0x371   : > { %2489 = vmatprep.mubr.msk.f32.mxu0 %vm1638_vm5, %v1611_v30 }
 0x372   : > { %v1568_v33 = vpop.permute.xlu1 %1567  ;;  %2490 = vmatmul.mubr.msk.f32.vlgmr.msra.gmra.mxu0 %vm1638_vm5, %v1612_v32 }
 0x373   : > { %v1614_v48 = vsel %vm1610_vm4, %v1601_v55, %v1568_v33 }
 0x374   : > { %v1566_v37 = vpop.permute.xlu0 %1565 }
 0x375   : > { %v1613_v38 = vsel %vm1610_vm4, %v1600_v35, %v1566_v37 }
 0x376   : > { %v1572_v40 = vpop.permute.xlu1 %1571  ;;  %2492 = vmatprep.mubr.msk.f32.mxu0 %vm1638_vm5, %v1613_v38 }
 0x377   : > { %2493 = vmatmul.mubr.msk.f32.gmra.mxu0 %vm1638_vm5, %v1614_v48  ;;  %v1616_v58 = vsel %vm1610_vm4, %v1603_v19, %v1572_v40 }
 0x378   : > { %v1570_v42 = vpop.permute.xlu0 %1569 }
 0x379   : > { %v1615_v43 = vsel %vm1610_vm4, %v1602_v41, %v1570_v42 }
 0x37a   : > { %v1576_v45 = vpop.permute.xlu1 %1575  ;;  %2495 = vmatprep.mubr.msk.f32.mxu0 %vm1638_vm5, %v1615_v43 }
 0x37b   : > { %2496 = vmatmul.mubr.msk.f32.gmra.mxu0 %vm1638_vm5, %v1616_v58  ;;  %v1618_v28 = vsel %vm1610_vm4, %v1605_v0, %v1576_v45 }
 0x37c   : > { %v1574_v47 = vpop.permute.xlu0 %1573 }
 0x37d   : > { %v1617_v50 = vsel %vm1610_vm4, %v1604_v46, %v1574_v47 }
 0x37e   : > { %v1580_v51 = vpop.permute.xlu1 %1579  ;;  %2498 = vmatprep.mubr.msk.f32.mxu0 %vm1638_vm5, %v1617_v50 }
 0x37f   : > { %2499 = vmatmul.mubr.msk.f32.gmra.mxu0 %vm1638_vm5, %v1618_v28  ;;  %v1620_v2 = vsel %vm1610_vm4, %v1607_v4, %v1580_v51 }
 0x380   : > { %v1578_v53 = vpop.permute.xlu0 %1577 }
 0x381   : > { %v1619_v56 = vsel %vm1610_vm4, %v1606_v52, %v1578_v53 }
 0x382   : > { %2501 = vmatprep.mubr.msk.f32.mxu0 %vm1638_vm5, %v1619_v56  ;;  %v1584_v57 = vpop.permute.xlu1 %1583 }
 0x383   : > { %2502 = vmatmul.mubr.msk.f32.gmra.mxu0 %vm1638_vm5, %v1620_v2  ;;  %v1622_v49 = vsel %vm1610_vm4, %v1609_v8, %v1584_v57 }
 0x384   : > { %v1582_v60 = vpop.permute.xlu0 %1581 }
 0x385   : > { %v1621_v23 = vsel %vm1610_vm4, %v1608_v16, %v1582_v60 }
 0x386   : > { %2504 = vmatprep.mubr.msk.f32.mxu0 %vm1638_vm5, %v1621_v23 }
 0x387   : > { %2505 = vmatmul.mubr.msk.f32.gmra.mxu0 %vm1638_vm5, %v1622_v49 }
 0x388   : > { %v1636_v9 = vpop.permute.xlu0 %1635 }
 0x432   : > { %v2491_v5 = vpop.f32.mrf.mxu0 }
 0x433   : > { %v1747_v47 = vadd.f32 %v2491_v5, %v1636_v9 }
 0x434   : > { %v1741_v7 = vpop.f32.mrf.mxu0 }
 0x435   : > { %v1742_v45 = vadd.f32 %v1741_v7, %v1636_v9  ;;  %v1801_v51 = vmax.f32 %v1747_v47, 0.0 }
 0x437   : > { %v2494_v10 = vpop.f32.mrf.mxu0  ;;  %v1800_v50 = vmax.f32 %v1742_v45, 0.0 }
 0x438   : > { %v3046_v36 = vadd.f32 %v2494_v10, %v1636_v9 }
 0x439   : > { %v1751_v11 = vpop.f32.mrf.mxu0 }
 0x43a   : > { %v1803_v12 = vmax.f32 %v3046_v36, 0.0  ;;  %v1752_v13 = vadd.f32 %v1751_v11, %v1636_v9 }
 0x43b   : > { %v2497_v15 = vpop.f32.mrf.mxu0 }
 0x43c   : > { %v1802_v17 = vmax.f32 %v1752_v13, 0.0  ;;  %v1767_v18 = vadd.f32 %v2497_v15, %v1636_v9  ;;  %1822 = vrot.lane.b32.xlu0 %v1803_v12, %s2649_s16 }
 0x43d   : > { %v1761_v20 = vpop.f32.mrf.mxu0 }
 0x43e   : > { %v3052_v21 = vmax.f32 %v1767_v18, 0.0  ;;  %v1762_v22 = vadd.f32 %v1761_v20, %v1636_v9  ;;  %1820 = vrot.lane.b32.xlu1 %v1802_v17, %s2649_s16 }
 0x43f   : > { %v2500_v24 = vpop.f32.mrf.mxu0 }
 0x440   : > { %v1804_v25 = vmax.f32 %v1762_v22, 0.0  ;;  %1848 = vrot.lane.b32.xlu0 %v3052_v21, %s2650_s24  ;;  %v1777_v27 = vadd.f32 %v2500_v24, %v1636_v9 }
 0x441   : > { %v1771_v26 = vpop.f32.mrf.mxu0 }
 0x442   : > { %1846 = vrot.lane.b32.xlu1 %v1804_v25, %s2650_s24  ;;  %v1772_v29 = vadd.f32 %v1771_v26, %v1636_v9  ;;  %v3060_v32 = vmax.f32 %v1777_v27, 0.0 }
 0x443   : > { %v2503_v30 = vpop.f32.mrf.mxu0 }
 0x444   : > { %1826 = vrot.lane.b32.xlu0 %v3052_v21, %s2649_s16  ;;  %v1806_v33 = vmax.f32 %v1772_v29, 0.0  ;;  %v1787_v37 = vadd.f32 %v2503_v30, %v1636_v9 }
 0x445   : > { %v1781_v35 = vpop.f32.mrf.mxu0 }
 0x446   : > { %1824 = vrot.lane.b32.xlu1 %v1804_v25, %s2649_s16  ;;  %v1782_v55 = vadd.f32 %v1781_v35, %v1636_v9  ;;  %v1809_v48 = vmax.f32 %v1787_v37, 0.0 }
 0x447   : > { %v2506_v38 = vpop.f32.mrf.mxu0 }
 0x448   : > { %1852 = vrot.lane.b32.xlu0 %v3060_v32, %s2650_s24  ;;  %v1808_v40 = vmax.f32 %v1782_v55, 0.0  ;;  %v1797_v42 = vadd.f32 %v2506_v38, %v1636_v9 }
 0x449   : > { %v1791_v41 = vpop.f32.mrf.mxu0 }
 0x44a   : > { %1850 = vrot.lane.b32.xlu1 %v1806_v33, %s2650_s24  ;;  %v1792_v19 = vadd.f32 %v1791_v41, %v1636_v9  ;;  %v1811_v43 = vmax.f32 %v1797_v42, 0.0 }
 0x44c   : > { %1830 = vrot.lane.b32.xlu0 %v3060_v32, %s2649_s16  ;;  %v1810_v58 = vmax.f32 %v1792_v19, 0.0 }
 0x44e   : > { %1828 = vrot.lane.b32.xlu1 %v1806_v33, %s2649_s16 }
 0x450   : > { %1856 = vrot.lane.b32.xlu0 %v1809_v48, %s2650_s24 }
 0x452   : > { %1854 = vrot.lane.b32.xlu1 %v1808_v40, %s2650_s24 }
 0x454   : > { %1834 = vrot.lane.b32.xlu0 %v1809_v48, %s2649_s16 }
 0x456   : > { %1832 = vrot.lane.b32.xlu1 %v1808_v40, %s2649_s16 }
 0x458   : > { %1860 = vrot.lane.b32.xlu0 %v1811_v43, %s2650_s24 }
 0x45a   : > { %1858 = vrot.lane.b32.xlu1 %v1810_v58, %s2650_s24  ;;  %s2252_s24 = sshll.u32 %s3170_s22, 6 }
 0x45b   : > { %s3134_s7 = scalar_lea.vmem %s3168_s6, %s2252_s24 }
 0x45e   : > { %1898 = vrot.lane.b32.xlu1 %v2722_v14, %s2649_s16  ;;  %s2651_s16 = smov 120  }
 0x4ae   : > { %v1823_v46 = vpop.permute.xlu0 %1822 }
 0x4af   : > { %v1871_v4 = vsel %vm1597_vm3, %v1801_v51, %v1823_v46 }
 0x4b0   : > { %v1821_v0 = vpop.permute.xlu1 %1820 }
 0x4b1   : > { %v1870_v52 = vsel %vm1597_vm3, %v1800_v50, %v1821_v0 }
 0x4b2   : > { %v1849_v28 = vpop.permute.xlu0 %1848 }
 0x4b3   : > { %v1879_v2 = vsel %vm1610_vm4, %v1871_v4, %v1849_v28 }
 0x4b4   : > { %v1847_v53 = vpop.permute.xlu1 %1846 }
 0x4b5   : > { %v1878_v56 = vsel %vm1610_vm4, %v1870_v52, %v1847_v53 }
 0x4b6   : > { %v1827_v57 = vpop.permute.xlu0 %1826  ;;  %2531 = vmatprep.mubr.msk.f32.mxu1 %vm1638_vm5, %v1878_v56 }
 0x4b7   : > { %2532 = vmatmul.mubr.msk.f32.vlgmr.msra.gmra.mxu1 %vm1638_vm5, %v1879_v2  ;;  %v1873_v23 = vsel %vm1597_vm3, %v1803_v12, %v1827_v57 }
 0x4b8   : > { %v1825_v14 = vpop.permute.xlu1 %1824 }
 0x4b9   : > { %v1872_v60 = vsel %vm1597_vm3, %v1802_v17, %v1825_v14 }
 0x4ba   : > { %v1853_v16 = vpop.permute.xlu0 %1852 }
 0x4bb   : > { %v1881_v61 = vsel %vm1610_vm4, %v1873_v23, %v1853_v16 }
 0x4bc   : > { %v1851_v8 = vpop.permute.xlu1 %1850 }
 0x4bd   : > { %v1880_v49 = vsel %vm1610_vm4, %v1872_v60, %v1851_v8 }
 0x4be   : > { %v1831_v31 = vpop.permute.xlu0 %1830  ;;  %2534 = vmatprep.mubr.msk.f32.mxu1 %vm1638_vm5, %v1880_v49 }
 0x4bf   : > { %2535 = vmatmul.mubr.msk.f32.gmra.mxu1 %vm1638_vm5, %v1881_v61  ;;  %v1875_v1 = vsel %vm1597_vm3, %v3052_v21, %v1831_v31 }
 0x4c0   : > { %v1829_v59 = vpop.permute.xlu1 %1828 }
 0x4c1   : > { %v1874_v34 = vsel %vm1597_vm3, %v1804_v25, %v1829_v59 }
 0x4c2   : > { %v1857_v62 = vpop.permute.xlu0 %1856 }
 0x4c3   : > { %v1883_v44 = vsel %vm1610_vm4, %v1875_v1, %v1857_v62 }
 0x4c4   : > { %v1855_v63 = vpop.permute.xlu1 %1854 }
 0x4c5   : > { %v1882_v39 = vsel %vm1610_vm4, %v1874_v34, %v1855_v63 }
 0x4c6   : > { %v1835_v3 = vpop.permute.xlu0 %1834  ;;  %2537 = vmatprep.mubr.msk.f32.mxu1 %vm1638_vm5, %v1882_v39 }
 0x4c7   : > { %2538 = vmatmul.mubr.msk.f32.gmra.mxu1 %vm1638_vm5, %v1883_v44  ;;  %v1877_v9 = vsel %vm1597_vm3, %v3060_v32, %v1835_v3 }
 0x4c8   : > { %v1833_v5 = vpop.permute.xlu1 %1832 }
 0x4c9   : > { %v1876_v7 = vsel %vm1597_vm3, %v1806_v33, %v1833_v5 }
 0x4ca   : > { %v1861_v6 = vpop.permute.xlu0 %1860 }
 0x4cb   : > { %v1885_v36 = vsel %vm1610_vm4, %v1877_v9, %v1861_v6 }
 0x4cc   : > { %v1859_v54 = vpop.permute.xlu1 %1858 }
 0x4cd   : > { %v1884_v10 = vsel %vm1610_vm4, %v1876_v7, %v1859_v54 }
 0x4ce   : > { %2540 = vmatprep.mubr.msk.f32.mxu1 %vm1638_vm5, %v1884_v10 }
 0x4cf   : > { %2541 = vmatmul.mubr.msk.f32.gmra.mxu1 %vm1638_vm5, %v1885_v36 }
 0x4d0   : > { %v1899_v11 = vpop.permute.xlu1 %1898 }
 0x577   : > { %v2533_v12 = vpop.f32.mrf.mxu1 }
 0x578   : > { %v3105_v13 = vadd.f32 %v2533_v12, %v1899_v11 }
 0x579   : > { %v1991_v15 = vpop.f32.mrf.mxu1 }
 0x57a   : > { %v2031_v17 = vsub.f32 0.0, %v3105_v13  ;;  %v3108_v18 = vadd.f32 %v1991_v15, %v1899_v11 }
 0x57c   : > { %v2040_v20 = vmul.f32 1.442695, %v2031_v17  ;;  %v2030_v21 = vsub.f32 0.0, %v3108_v18 }
 0x57e   : > { %2608 = vpow2.f32 %v2040_v20  ;;  %v2038_v22 = vmul.f32 1.442695, %v2030_v21 }
 0x57f   : > { %v2536_v24 = vpop.f32.mrf.mxu1 }
 0x580   : > { %2610 = vpow2.f32 %v2038_v22  ;;  %v3111_v25 = vadd.f32 %v2536_v24, %v1899_v11 }
 0x581   : > { %v2001_v26 = vpop.f32.mrf.mxu1 }
 0x582   : > { %v2033_v27 = vsub.f32 0.0, %v3111_v25  ;;  %v3114_v29 = vadd.f32 %v2001_v26, %v1899_v11 }
 0x584   : > { %v2044_v30 = vmul.f32 1.442695, %v2033_v27  ;;  %v2032_v32 = vsub.f32 0.0, %v3114_v29 }
 0x586   : > { %2612 = vpow2.f32 %v2044_v30  ;;  %v2042_v33 = vmul.f32 1.442695, %v2032_v32 }
 0x587   : > { %v2539_v35 = vpop.f32.mrf.mxu1 }
 0x588   : > { %2614 = vpow2.f32 %v2042_v33  ;;  %v3117_v37 = vadd.f32 %v2539_v35, %v1899_v11 }
 0x589   : > { %v2011_v55 = vpop.f32.mrf.mxu1 }
 0x58a   : > { %v2035_v38 = vsub.f32 0.0, %v3117_v37  ;;  %v3120_v48 = vadd.f32 %v2011_v55, %v1899_v11 }
 0x58b   : > { %v2609_v40 = vpop.eup %2608 }
 0x58c   : > { %v2055_v41 = vadd.f32 1.0, %v2609_v40  ;;  %v2048_v42 = vmul.f32 1.442695, %v2035_v38  ;;  %v2034_v19 = vsub.f32 0.0, %v3120_v48 }
 0x58d   : > { %v2611_v43 = vpop.eup %2610 }
 0x58e   : > { %2616 = vrcp.f32 %v2055_v41  ;;  %v2054_v58 = vadd.f32 1.0, %v2611_v43  ;;  %v2046_v45 = vmul.f32 1.442695, %v2034_v19 }
 0x58f   : > { %2618 = vpow2.f32 %v2048_v42  ;;  %v2542_v46 = vpop.f32.mrf.mxu1 }
 0x590   : > { %2620 = vrcp.f32 %v2054_v58  ;;  %v3123_v47 = vadd.f32 %v2542_v46, %v1899_v11 }
 0x591   : > { %2622 = vpow2.f32 %v2046_v45  ;;  %v2021_v0 = vpop.f32.mrf.mxu1 }
 0x592   : > { %v2037_v50 = vsub.f32 0.0, %v3123_v47  ;;  %v3126_v28 = vadd.f32 %v2021_v0, %v1899_v11 }
 0x593   : > { %v2613_v51 = vpop.eup %2612 }
 0x594   : > { %v2057_v52 = vadd.f32 1.0, %v2613_v51  ;;  %v2052_v53 = vmul.f32 1.442695, %v2037_v50  ;;  %v2036_v4 = vsub.f32 0.0, %v3126_v28 }
 0x595   : > { %v2615_v56 = vpop.eup %2614 }
 0x596   : > { %2624 = vrcp.f32 %v2057_v52  ;;  %v2056_v2 = vadd.f32 1.0, %v2615_v56  ;;  %v2050_v57 = vmul.f32 1.442695, %v2036_v4 }
 0x597   : > { %2626 = vpow2.f32 %v2052_v53 }
 0x598   : > { %2628 = vrcp.f32 %v2056_v2 }
 0x599   : > { %2630 = vpow2.f32 %v2050_v57 }
 0x59b   : > { %v2617_v14 = vpop.eup %2616 }
 0x59c   : > { %v2619_v16 = vpop.eup %2618  ;;  %2080 = vrot.lane.b32.xlu1 %v2617_v14, %s2651_s16 }
 0x59d   : > { %v2621_v60 = vpop.eup %2620  ;;  %v2059_v8 = vadd.f32 1.0, %v2619_v16 }
 0x59e   : > { %v2623_v23 = vpop.eup %2622  ;;  %2078 = vrot.lane.b32.xlu0 %v2621_v60, %s2651_s16 }
 0x59f   : > { %2632 = vrcp.f32 %v2059_v8  ;;  %v2058_v49 = vadd.f32 1.0, %v2623_v23 }
 0x5a1   : > { %2634 = vrcp.f32 %v2058_v49 }
 0x5a3   : > { %v2625_v61 = vpop.eup %2624 }
 0x5a4   : > { %v2627_v31 = vpop.eup %2626  ;;  %2084 = vrot.lane.b32.xlu1 %v2625_v61, %s2651_s16 }
 0x5a5   : > { %v2629_v59 = vpop.eup %2628  ;;  %v2061_v62 = vadd.f32 1.0, %v2627_v31 }
 0x5a6   : > { %v2631_v34 = vpop.eup %2630  ;;  %2082 = vrot.lane.b32.xlu0 %v2629_v59, %s2651_s16 }
 0x5a7   : > { %2636 = vrcp.f32 %v2061_v62  ;;  %v2060_v63 = vadd.f32 1.0, %v2631_v34 }
 0x5a9   : > { %2638 = vrcp.f32 %v2060_v63 }
 0x5ac   : > { %v2633_v1 = vpop.eup %2632 }
 0x5ad   : > { %2088 = vrot.lane.b32.xlu1 %v2633_v1, %s2651_s16 }
 0x5ae   : > { %v2635_v39 = vpop.eup %2634 }
 0x5af   : > { %2086 = vrot.lane.b32.xlu0 %v2635_v39, %s2651_s16 }
 0x5b4   : > { %v2637_v44 = vpop.eup %2636 }
 0x5b5   : > { %2092 = vrot.lane.b32.xlu1 %v2637_v44, %s2651_s16 }
 0x5b6   : > { %v2639_v3 = vpop.eup %2638 }
 0x5b7   : > { %2090 = vrot.lane.b32.xlu0 %v2639_v3, %s2651_s16 }
 0x60e   : > { %v2081_v5 = vpop.permute.xlu1 %2080 }
 0x60f   : > { %v2103_v6 = vadd.f32 %v2081_v5, %v3105_v13 }
 0x610   : > { %v2079_v7 = vpop.permute.xlu0 %2078 }
 0x611   : > { %v2111_v54 = vmax.f32 %v2103_v6, 0.0  ;;  %v2102_v9 = vadd.f32 %v2079_v7, %v3108_v18 }
 0x613   : > { %2120 = vst.msk [vmem:[%s3134_s7 + $0x8] sm:$0xff] %vm2118_vm6, %v2111_v54  ;;  %v2110_v10 = vmax.f32 %v2102_v9, 0.0 }
 0x615   : > { %2119 = vst.msk [vmem:[%s3134_s7] sm:$0xff] %vm2118_vm6, %v2110_v10 }
 0x616   : > { %v2085_v36 = vpop.permute.xlu1 %2084 }
 0x617   : > { %v2105_v11 = vadd.f32 %v2085_v36, %v3111_v25 }
 0x618   : > { %v2083_v12 = vpop.permute.xlu0 %2082 }
 0x619   : > { %v2113_v13 = vmax.f32 %v2105_v11, 0.0  ;;  %v2104_v15 = vadd.f32 %v2083_v12, %v3114_v29 }
 0x61b   : > { %2122 = vst.msk [vmem:[%s3134_s7 + $0x18] sm:$0xff] %vm2118_vm6, %v2113_v13  ;;  %v2112_v17 = vmax.f32 %v2104_v15, 0.0 }
 0x61d   : > { %2121 = vst.msk [vmem:[%s3134_s7 + $0x10] sm:$0xff] %vm2118_vm6, %v2112_v17 }
 0x61f   : > { %v2089_v18 = vpop.permute.xlu1 %2088 }
 0x620   : > { %v2107_v20 = vadd.f32 %v2089_v18, %v3117_v37 }
 0x621   : > { %v2087_v21 = vpop.permute.xlu0 %2086 }
 0x622   : > { %v2115_v22 = vmax.f32 %v2107_v20, 0.0  ;;  %v2106_v24 = vadd.f32 %v2087_v21, %v3120_v48 }
 0x624   : > { %2124 = vst.msk [vmem:[%s3134_s7 + $0x28] sm:$0xff] %vm2118_vm6, %v2115_v22  ;;  %v2114_v25 = vmax.f32 %v2106_v24, 0.0 }
 0x626   : > { %2123 = vst.msk [vmem:[%s3134_s7 + $0x20] sm:$0xff] %vm2118_vm6, %v2114_v25 }
 0x627   : > { %v2093_v26 = vpop.permute.xlu1 %2092 }
 0x628   : > { %v2109_v27 = vadd.f32 %v2093_v26, %v3123_v47 }
 0x629   : > { %v2091_v29 = vpop.permute.xlu0 %2090 }
 0x62a   : > { %v2117_v30 = vmax.f32 %v2109_v27, 0.0  ;;  %v2108_v32 = vadd.f32 %v2091_v29, %v3126_v28 }
 0x62c   : > { %2126 = vst.msk [vmem:[%s3134_s7 + $0x38] sm:$0xff] %vm2118_vm6, %v2117_v30  ;;  %v2116_v33 = vmax.f32 %v2108_v32, 0.0 }
 0x62e   : > { %2125 = vst.msk [vmem:[%s3134_s7 + $0x30] sm:$0xff] %vm2118_vm6, %v2116_v33 }
 0x62f PF: > { %s16_s21 = sadd.s32 1, %s2646_s21  }
 0x630   : > { %p13_p4 = scmp.ge.s32.totalorder %s16_s21, 4  }
 0x632   :  { %15 = sbr.rel (!%p13_p4) target bundleno = 1 (0x1), region = 75 }

</bundles_post_ra>
